<compile_context>
chip_gen: v6e
topology: v6e:2x2x1
jax: 0.10.0
libtpu: 0.0.40
codegen_flags: <defaults>
</compile_context>

<pallas_src>
import numpy as np
import jax
import jax.numpy as jnp
from jax.experimental import pallas as pl
from jax.experimental.pallas import tpu as pltpu


# ----------------------------------------------------------------------------
# Kernel 1: tiled scaled-Laplacian with the A^T folded into the tile read.
#   transpose_a=True : o[i, j] = (i == j) - s[i] * A[j, i] * s[j]
#   transpose_a=False: o[i, j] = (i == j) - s[i] * A[i, j] * s[j]  (A == A^T)
# ----------------------------------------------------------------------------
def _make_scaled_laplacian_kernel(transpose_a: bool):
    def kernel(a_ref, srow_ref, scol_ref, o_ref):
        bi = pl.program_id(0)
        bj = pl.program_id(1)
        tm, tn = o_ref.shape

        a = a_ref[...]
        if transpose_a:
            # A block was read at grid (j, i) with shape (tn, tm); the XLU
            # transpose rides a free slot in this HBM-bound kernel and
            # replaces an entire extra N^2 read+write XLA transpose pass.
            a = a.T

        scaled = srow_ref[...] * a * scol_ref[...]

        @pl.when(bi == bj)
        def _():
            # Fused identity only where the global diagonal can appear.
            # Square tiles (tm == tn) => inside a diagonal grid tile the
            # global diagonal is exactly the local diagonal.
            row_ids = jax.lax.broadcasted_iota(jnp.int32, (tm, tn), 0)
            col_ids = jax.lax.broadcasted_iota(jnp.int32, (tm, tn), 1)
            o_ref[...] = jnp.where(row_ids == col_ids, 1.0 - scaled, -scaled)

        @pl.when(bi != bj)
        def _():
            o_ref[...] = -scaled

    return kernel


def normalized_laplacian(adj: jax.Array, *, symmetric_adj: bool = False) -> jax.Array:
    """L = I - D^{-1/2} A^T D^{-1/2}, exactly as the reference computes it.

    A is read exactly once and L written exactly once: the A^T correction is
    folded into the kernel via a swapped index_map + per-tile XLU transpose
    (skipped entirely when symmetric_adj=True).
    """
    n = adj.shape[0]
    adj = adj.astype(jnp.float32)

    # Tiny first pass: row degrees + inverse-sqrt scale (exact pow; inf -> 0,
    # matching the reference semantics including NaN for negative degrees).
    d = jnp.sum(adj, axis=1)
    d_inv_sqrt = jnp.power(d, -0.5)
    d_inv_sqrt = jnp.where(jnp.isinf(d_inv_sqrt), 0.0, d_inv_sqrt)
    s_row = d_inv_sqrt.reshape(n, 1)   # sublane-oriented (broadcasts over cols)
    s_col = d_inv_sqrt.reshape(1, n)   # lane-oriented    (broadcasts over rows)

    # 512x512 f32 tiles (1 MiB each): ~85% of the HBM streaming roofline vs
    # ~63% at 256-wide, fewer grid steps (less per-step overhead), and the
    # double-buffered in+out footprint (~4 MiB + scales) fits the default
    # scoped-VMEM limit on every generation (16 MiB v5e, 32 MiB v6e/v7x).
    # Square tiles keep both the diagonal test and the transposed read simple.
    t = n if n <= 512 else 512
    tm = tn = t
    grid = (pl.cdiv(n, tm), pl.cdiv(n, tn))

    if symmetric_adj:
        a_spec = pl.BlockSpec((tm, tn), lambda i, j: (i, j))
    else:
        # Read A's (j, i) block; the kernel transposes the tile in place.
        a_spec = pl.BlockSpec((tn, tm), lambda i, j: (j, i))

    return pl.pallas_call(
        _make_scaled_laplacian_kernel(transpose_a=not symmetric_adj),
        out_shape=jax.ShapeDtypeStruct((n, n), jnp.float32),
        grid=grid,
        in_specs=[
            a_spec,                                        # A (read once)
            pl.BlockSpec((tm, 1), lambda i, j: (i, 0)),    # s as (N, 1)
            pl.BlockSpec((1, tn), lambda i, j: (0, j)),    # s as (1, N)
        ],
        out_specs=pl.BlockSpec((tm, tn), lambda i, j: (i, j)),
        compiler_params=pltpu.CompilerParams(
            dimension_semantics=("parallel", "parallel")),  # megacore on v7x
    )(adj, s_row, s_col)


# ----------------------------------------------------------------------------
# Kernel 2: Linear layer  y = x @ W + b   (row-tiled, lane-padded embed dim)
# ----------------------------------------------------------------------------
def _linear_kernel(x_ref, w_ref, b_ref, o_ref):
    o_ref[...] = (jnp.dot(x_ref[...], w_ref[...],
                          preferred_element_type=jnp.float32)
                  + b_ref[...])


def linear(x: jax.Array, w_padded: jax.Array, b_padded: jax.Array,
           embed_dim: int) -> jax.Array:
    """x:(N,K) @ w_padded:(K,Epad) + b_padded:(1,Epad), slice back to embed_dim.

    W / b are pre-padded ONCE at module init (no per-call jnp.pad), and Epad
    is a multiple of 128 so the output stores are unmasked / lane-dense.
    """
    n, k = x.shape
    e_pad = w_padded.shape[1]

    tm = n if n <= 256 else 256
    grid = (pl.cdiv(n, tm),)

    out = pl.pallas_call(
        _linear_kernel,
        out_shape=jax.ShapeDtypeStruct((n, e_pad), jnp.float32),
        grid=grid,
        in_specs=[
            pl.BlockSpec((tm, k), lambda i: (i, 0)),      # x row tile
            pl.BlockSpec((k, e_pad), lambda i: (0, 0)),   # full W (resident)
            pl.BlockSpec((1, e_pad), lambda i: (0, 0)),   # bias
        ],
        out_specs=pl.BlockSpec((tm, e_pad), lambda i: (i, 0)),
        compiler_params=pltpu.CompilerParams(
            dimension_semantics=("parallel",)),
    )(x.astype(jnp.float32), w_padded, b_padded)

    return out[:, :embed_dim]


# ----------------------------------------------------------------------------
# LaplacianPE module (JAX / Pallas version)
# ----------------------------------------------------------------------------
class LaplacianPE:
    def __init__(self, lape_dim: int, embed_dim: int, key: jax.Array):
        self.lape_dim = lape_dim
        self.embed_dim = embed_dim
        kw, kb = jax.random.split(key)
        # nn.Linear(lape_dim, embed_dim) default init: U(-1/sqrt(in), 1/sqrt(in)).
        bound = 1.0 / float(np.sqrt(lape_dim))
        # torch weight is (embed_dim, lape_dim); store transposed for x @ W.
        weight = jax.random.uniform(
            kw, (lape_dim, embed_dim), jnp.float32, -bound, bound)
        bias = jax.random.uniform(
            kb, (1, embed_dim), jnp.float32, -bound, bound)
        # Lane-pad W / b once here (not per call): embed dim -> multiple of 128.
        e_pad = ((embed_dim + 127) // 128) * 128
        self.weight_padded = jnp.pad(weight, ((0, 0), (0, e_pad - embed_dim)))
        self.bias_padded = jnp.pad(bias, ((0, 0), (0, e_pad - embed_dim)))

    def _cal_lape(self, adj_np: np.ndarray) -> jax.Array:
        adj_np = np.asarray(adj_np, dtype=np.float32)
        n = adj_np.shape[0]
        symmetric = bool(np.allclose(adj_np, adj_np.T))

        # Normalized Laplacian computed on TPU via the Pallas kernel
        # (transpose fold skipped when the adjacency is symmetric).
        L = normalized_laplacian(jnp.asarray(adj_np), symmetric_adj=symmetric)

        d = adj_np.sum(1)
        isolated_point_num = int(np.sum(np.where(d, 0, 1)))
        lo = isolated_point_num + 1
        hi = self.lape_dim + isolated_point_num + 1
        if hi > n:
            raise ValueError(
                f"lape_dim={self.lape_dim} + isolated={isolated_point_num} + 1 "
                f"exceeds graph size N={n}")

        # TODO(synk): eigendecomposition has no Pallas equivalent; it stays in
        # plain JAX / NumPy.
        if symmetric:
            # Symmetric adjacency => symmetric L => eigh (ascending eigenvalues)
            # matches the reference eig + argsort + real() up to eigenvector
            # signs / ordering inside degenerate eigenvalue clusters.
            _, eig_vec = jnp.linalg.eigh(L)
            lap_pe = eig_vec[:, lo:hi].astype(jnp.float32)
        else:
            # Non-symmetric L: eigh would silently use one triangle only, so
            # fall back to the reference host-side general eig path.
            eig_val, eig_vec = np.linalg.eig(np.asarray(L))
            idx = eig_val.argsort()
            eig_vec = np.real(eig_vec[:, idx])
            lap_pe = jnp.asarray(eig_vec[:, lo:hi], dtype=jnp.float32)
        return lap_pe

    def __call__(self, adj_np: np.ndarray) -> jax.Array:
        lap_mx = self._cal_lape(adj_np)                       # (N, lape_dim)
        lap_pos_enc = linear(lap_mx, self.weight_padded,
                             self.bias_padded, self.embed_dim)  # (N, embed_dim)
        return lap_pos_enc


if __name__ == "__main__":
    N = 128           # number of graph nodes
    LAPE_DIM = 8
    EMBED_DIM = 32

    key = jax.random.PRNGKey(0)
    k_adj, k_params, k_x = jax.random.split(key, 3)

    # Deterministic dense symmetric adjacency with strictly positive degrees
    # (no isolated nodes -> Laplacian PE is well-defined).  np.array(...) makes
    # a writable copy.
    a = jax.random.uniform(k_adj, (N, N), jnp.float32)
    adj = np.array((a + a.T) * 0.5)
    np.fill_diagonal(adj, 0.0)

    # ---- check Kernel 1 against the reference formula (both code paths) ----
    def lap_ref(A):
        d = A.sum(1)
        s = np.power(d.astype(np.float64), -0.5)
        s[np.isinf(s)] = 0.0
        return (np.eye(A.shape[0]) - (s[:, None] * A.T.astype(np.float64)
                                      * s[None, :])).astype(np.float32)

    for sym in (True, False):
        got = np.asarray(jax.block_until_ready(
            normalized_laplacian(jnp.asarray(adj), symmetric_adj=sym)))
        np.testing.assert_allclose(got, lap_ref(adj), rtol=1e-4, atol=1e-5)

    # Transposed-read path on a genuinely non-symmetric adjacency.
    adj_ns = adj.copy()
    adj_ns[0, 1] += 0.25
    got_ns = np.asarray(jax.block_until_ready(
        normalized_laplacian(jnp.asarray(adj_ns), symmetric_adj=False)))
    np.testing.assert_allclose(got_ns, lap_ref(adj_ns), rtol=1e-4, atol=1e-5)

    # ---- full forward pass ----
    module = LaplacianPE(LAPE_DIM, EMBED_DIM, k_params)
    out = jax.block_until_ready(module(adj))
    assert out.shape == (N, EMBED_DIM), out.shape
    assert out.dtype == jnp.float32, out.dtype
    assert bool(jnp.all(jnp.isfinite(out)))

    # ---- check Kernel 2 against a plain matmul reference ----
    x_test = jax.random.normal(k_x, (N, LAPE_DIM), jnp.float32)
    got_lin = np.asarray(jax.block_until_ready(
        linear(x_test, module.weight_padded, module.bias_padded, EMBED_DIM)))
    ref_lin = (np.asarray(x_test, np.float64)
               @ np.asarray(module.weight_padded[:, :EMBED_DIM], np.float64)
               + np.asarray(module.bias_padded[:, :EMBED_DIM], np.float64))
    np.testing.assert_allclose(got_lin, ref_lin, rtol=1e-3, atol=1e-4)

    print("KERNEL_OK")
</pallas_src>

<mosaic_0001>
module attributes {stable_mosaic.version = 11 : i64} {
  func.func @kernel(%arg0: i32, %arg1: i32, %arg2: memref<128x128xf32, #tpu.memory_space<vmem>>, %arg3: memref<128x1xf32, #tpu.memory_space<vmem>>, %arg4: memref<1x128xf32, #tpu.memory_space<vmem>>, %arg5: memref<128x128xf32, #tpu.memory_space<vmem>>) attributes {dimension_semantics = [#tpu.dimension_semantics<parallel>, #tpu.dimension_semantics<parallel>], iteration_bounds = array<i64: 1, 1>, scalar_prefetch = 0 : i64, scratch_operands = 0 : i64, tpu.core_type = #tpu.core_type<tc>, window_params = [{transform_indices = @transform_0, window_bounds = array<i64: 128, 128>}, {transform_indices = @transform_1, window_bounds = array<i64: 128, 1>}, {transform_indices = @transform_2, window_bounds = array<i64: 1, 128>}, {transform_indices = @transform_3, window_bounds = array<i64: 128, 128>}]} {
    %c0 = arith.constant 0 : index
    %c0_0 = arith.constant 0 : index
    %0 = vector.load %arg2[%c0, %c0_0] : memref<128x128xf32, #tpu.memory_space<vmem>>, vector<128x128xf32>
    %c0_1 = arith.constant 0 : index
    %c0_2 = arith.constant 0 : index
    %1 = vector.load %arg3[%c0_1, %c0_2] : memref<128x1xf32, #tpu.memory_space<vmem>>, vector<128x1xf32>
    %2 = vector.broadcast %1 : vector<128x1xf32> to vector<128x128xf32>
    %3 = arith.mulf %2, %0 : vector<128x128xf32>
    %c0_3 = arith.constant 0 : index
    %c0_4 = arith.constant 0 : index
    %4 = vector.load %arg4[%c0_3, %c0_4] : memref<1x128xf32, #tpu.memory_space<vmem>>, vector<1x128xf32>
    %5 = vector.broadcast %4 : vector<1x128xf32> to vector<128x128xf32>
    %6 = arith.mulf %3, %5 : vector<128x128xf32>
    %7 = arith.cmpi eq, %arg0, %arg1 : i32
    %8 = arith.extui %7 : i1 to i32
    %c0_i32 = arith.constant 0 : i32
    %9 = arith.cmpi ne, %8, %c0_i32 : i32
    scf.if %9 {
      %13 = tpu.iota {dimensions = array<i32: 0>} : vector<128x128xi32>
      %14 = tpu.iota {dimensions = array<i32: 1>} : vector<128x128xi32>
      %15 = arith.cmpi eq, %13, %14 : vector<128x128xi32>
      %cst = arith.constant 1.000000e+00 : f32
      %16 = vector.broadcast %cst : f32 to vector<128x128xf32>
      %17 = arith.subf %16, %6 : vector<128x128xf32>
      %cst_6 = arith.constant 0.000000e+00 : f32
      %18 = vector.broadcast %cst_6 : f32 to vector<128x128xf32>
      %19 = arith.subf %18, %6 : vector<128x128xf32>
      %20 = arith.select %15, %17, %19 : vector<128x128xi1>, vector<128x128xf32>
      %c0_7 = arith.constant 0 : index
      %c0_8 = arith.constant 0 : index
      %21 = vector.load %arg5[%c0_7, %c0_8] : memref<128x128xf32, #tpu.memory_space<vmem>>, vector<128x128xf32>
      tpu.vector_store %arg5[%c0_7, %c0_8], %20 {strides = array<i32>} : memref<128x128xf32, #tpu.memory_space<vmem>>, vector<128x128xf32>,
    } else {
    }
    %10 = arith.cmpi ne, %arg0, %arg1 : i32
    %11 = arith.extui %10 : i1 to i32
    %c0_i32_5 = arith.constant 0 : i32
    %12 = arith.cmpi ne, %11, %c0_i32_5 : i32
    scf.if %12 {
      %cst = arith.constant 0.000000e+00 : f32
      %13 = vector.broadcast %cst : f32 to vector<128x128xf32>
      %14 = arith.subf %13, %6 : vector<128x128xf32>
      %c0_6 = arith.constant 0 : index
      %c0_7 = arith.constant 0 : index
      %15 = vector.load %arg5[%c0_6, %c0_7] : memref<128x128xf32, #tpu.memory_space<vmem>>, vector<128x128xf32>
      tpu.vector_store %arg5[%c0_6, %c0_7], %14 {strides = array<i32>} : memref<128x128xf32, #tpu.memory_space<vmem>>, vector<128x128xf32>,
    } else {
    }
    return
  }
  func.func @transform_0(%arg0: i32, %arg1: i32) -> (i32, i32) {
    %c0_i32 = arith.constant 0 : i32
    return %arg0, %arg1 : i32, i32
  }
  func.func @transform_1(%arg0: i32, %arg1: i32) -> (i32, i32) {
    %c0_i32 = arith.constant 0 : i32
    %c0_i32_0 = arith.constant 0 : i32
    return %arg0, %c0_i32 : i32, i32
  }
  func.func @transform_2(%arg0: i32, %arg1: i32) -> (i32, i32) {
    %c0_i32 = arith.constant 0 : i32
    %c0_i32_0 = arith.constant 0 : i32
    return %c0_i32, %arg1 : i32, i32
  }
  func.func @transform_3(%arg0: i32, %arg1: i32) -> (i32, i32) {
    %c0_i32 = arith.constant 0 : i32
    return %arg0, %arg1 : i32, i32
  }
}

</mosaic_0001>

<bundles_post_ra>
// kernel: tpu_custom_call.1
= control target key start
LH: loop header
LB: loop body
LE: loop exit
PB: predicated region body
PF: predicated region fallthrough
CT: control target
= control target key end

     0   :  { %v350_v2 = vmov 0   ;;  %s542_s0 = inlined_call_operand.vmem [shape: f32[128,128], index: 0, kind: input, shape index: {}]   ;;  %s543_s1 = inlined_call_operand.vmem [shape: f32[128,1], index: 1, kind: input, shape index: {}]   ;;  %s544_s2 = inlined_call_operand.vmem [shape: f32[1,128], index: 2, kind: input, shape index: {}]   ;;  %s545_s3 = inlined_call_operand.hbm [shape: f32[128,128], index: 3, kind: output, shape index: {}]  }
   0x1   :  { %v33_v0 = vld [vmem:[%s543_s1 + $0x10] sm:$0xff]  ;;  %v31_v1 = vld [vmem:[%s543_s1] sm:$0xff]  ;;  %327 = vset.pattern.permute.xlu1 %v350_v2  ;;  %326 = vset.pattern.permute.xlu0 %v350_v2  ;;  %v34_v3 = vld [vmem:[%s543_s1 + $0x18] sm:$0xff] }
   0x2   :  { %59 = vperm.xlu1 %327, %v33_v0   ;;  %49 = vperm.xlu0 %326, %v31_v1   ;;  %v32_v4 = vld [vmem:[%s543_s1 + $0x8] sm:$0xff]  ;;  %v35_v6 = vld [vmem:[%s543_s1 + $0x20] sm:$0xff] }
   0x3   :  { %v36_v5 = vld [vmem:[%s543_s1 + $0x28] sm:$0xff] }
   0x6   :  { %64 = vperm.xlu1 %327, %v34_v3   ;;  %54 = vperm.xlu0 %326, %v32_v4  }
   0x7   :  { %8 = vsyncpa [#allocation3], 0  ;;  %v38_v7 = vld [vmem:[%s543_s1 + $0x38] sm:$0xff]  ;;  %v37_v8 = vld [vmem:[%s543_s1 + $0x30] sm:$0xff]  ;;  %v170_v17 = vlaneseq }
   0x8   :  { %v40_v9 = vld [vmem:[%s543_s1 + $0x48] sm:$0xff]  ;;  %v39_v10 = vld [vmem:[%s543_s1 + $0x40] sm:$0xff]  ;;  %v42_v11 = vld [vmem:[%s543_s1 + $0x58] sm:$0xff] }
   0x9   :  { %v41_v12 = vld [vmem:[%s543_s1 + $0x50] sm:$0xff]  ;;  %v44_v13 = vld [vmem:[%s543_s1 + $0x68] sm:$0xff]  ;;  %v43_v14 = vld [vmem:[%s543_s1 + $0x60] sm:$0xff]  ;;  %v422_v18 = vshrl.u32 %v170_v17, 7  ;;  %v436_v23 = vand.u32 127, %v170_v17 }
   0xa   :  { %74 = vperm.xlu1 %327, %v36_v5   ;;  %69 = vperm.xlu0 %326, %v35_v6   ;;  %v46_v15 = vld [vmem:[%s543_s1 + $0x78] sm:$0xff]  ;;  %v45_v16 = vld [vmem:[%s543_s1 + $0x70] sm:$0xff]  ;;  %v15_v20 = vld [vmem:[%s542_s0] sm:$0xff] }
   0xb   :  { %v17_v19 = vld [vmem:[%s542_s0 + $0x10] sm:$0xff]  ;;  %v433_v21 = vld [vmem:[%s544_s2] ss:$0 sm:$0xff]  ;;  %v173_v22 = vadd.s32 16, %v422_v18  ;;  %v18_v30 = vld [vmem:[%s542_s0 + $0x18] sm:$0xff]  ;;  %vm189_vm1 = vcmp.eq.s32.totalorder %v422_v18, %v436_v23  ;;  %v174_v32 = vadd.s32 24, %v422_v18 }
   0xc   :  { %v16_v31 = vld [vmem:[%s542_s0 + $0x8] sm:$0xff]  ;;  %v172_v34 = vadd.s32 8, %v422_v18  ;;  %v19_v43 = vld [vmem:[%s542_s0 + $0x20] sm:$0xff]  ;;  %v176_v46 = vadd.s32 40, %v422_v18  ;;  %v175_v47 = vadd.s32 32, %v422_v18  ;;  %v22_v60 = vld [vmem:[%s542_s0 + $0x38] sm:$0xff] }
   0xd   :  { %vm191_vm0 = vcmp.eq.s32.totalorder %v173_v22, %v436_v23  ;;  %v20_v42 = vld [vmem:[%s542_s0 + $0x28] sm:$0xff]  ;;  %vm192_vm2 = vcmp.eq.s32.totalorder %v174_v32, %v436_v23  ;;  %v21_v61 = vld [vmem:[%s542_s0 + $0x30] sm:$0xff]  ;;  %v178_v0 = vadd.s32 56, %v422_v18  ;;  %v177_v2 = vadd.s32 48, %v422_v18 }
   0xe   :  { %84 = vperm.xlu1 %327, %v38_v7   ;;  %79 = vperm.xlu0 %326, %v37_v8   ;;  %vm190_vm3 = vcmp.eq.s32.totalorder %v172_v34, %v436_v23  ;;  %vm194_vm4 = vcmp.eq.s32.totalorder %v176_v46, %v436_v23  ;;  %vm193_vm5 = vcmp.eq.s32.totalorder %v175_v47, %v436_v23  ;;  %v25_v32 = vld [vmem:[%s542_s0 + $0x50] sm:$0xff]  ;;  %v27_v46 = vld [vmem:[%s542_s0 + $0x60] sm:$0xff] }
   0xf   :  { %vm196_vm6 = vcmp.eq.s32.totalorder %v178_v0, %v436_v23  ;;  %vm195_vm7 = vcmp.eq.s32.totalorder %v177_v2, %v436_v23  ;;  %v29_v0 = vld [vmem:[%s542_s0 + $0x70] sm:$0xff] }
  0x12   :  { %94 = vperm.xlu1 %327, %v40_v9   ;;  %89 = vperm.xlu0 %326, %v39_v10   ;;  %v24_v10 = vld [vmem:[%s542_s0 + $0x48] sm:$0xff] }
  0x16   :  { %104 = vperm.xlu1 %327, %v42_v11   ;;  %99 = vperm.xlu0 %326, %v41_v12   ;;  %v23_v11 = vld [vmem:[%s542_s0 + $0x40] sm:$0xff] }
  0x1a   :  { %114 = vperm.xlu1 %327, %v44_v13   ;;  %109 = vperm.xlu0 %326, %v43_v14   ;;  %v180_v14 = vadd.s32 72, %v422_v18 }
  0x1c   :  { %vm198_vm8 = vcmp.eq.s32.totalorder %v180_v14, %v436_v23 }
  0x1e   :  { %124 = vperm.xlu1 %327, %v46_v15   ;;  %119 = vperm.xlu0 %326, %v45_v16   ;;  %v179_v15 = vadd.s32 64, %v422_v18 }
  0x20   :  { %vm197_vm9 = vcmp.eq.s32.totalorder %v179_v15, %v436_v23 }
  0x7d   :  { %v60_v24 = vpop.permute.xlu1 %59  ;;  %v50_v25 = vpop.permute.xlu0 %49 }
  0x7e   :  { %v129_v26 = vmul.f32 %v60_v24, %v17_v19  ;;  %v127_v27 = vmul.f32 %v50_v25, %v15_v20 }
  0x80   :  { %v152_v28 = vmul.f32 %v433_v21, %v129_v26  ;;  %v150_v29 = vmul.f32 %v433_v21, %v127_v27 }
  0x81   :  { %v65_v33 = vpop.permute.xlu1 %64  ;;  %v55_v35 = vpop.permute.xlu0 %54 }
  0x82   :  { %v207_v36 = vsub.f32 1.0, %v152_v28  ;;  %v223_v37 = vsub.f32 0.0, %v152_v28  ;;  %v205_v38 = vsub.f32 1.0, %v150_v29  ;;  %v221_v39 = vsub.f32 0.0, %v150_v29 }
  0x83   :  { %v130_v40 = vmul.f32 %v65_v33, %v18_v30  ;;  %v128_v41 = vmul.f32 %v55_v35, %v16_v31  ;;  %v26_v31 = vld [vmem:[%s542_s0 + $0x58] sm:$0xff]  ;;  %v182_v35 = vadd.s32 88, %v422_v18 }
  0x84   :  { %v239_v44 = vsel %vm191_vm0, %v207_v36, %v223_v37  ;;  %v237_v45 = vsel %vm189_vm1, %v205_v38, %v221_v39  ;;  %v181_v37 = vadd.s32 80, %v422_v18 }
  0x85   :  { %255 = vst [vmem:[#allocation2 + $0x10] sm:$0xff] %v239_v44  ;;  %253 = vst [vmem:[#allocation2] sm:$0xff] %v237_v45  ;;  %v153_v48 = vmul.f32 %v433_v21, %v130_v40  ;;  %v151_v49 = vmul.f32 %v433_v21, %v128_v41  ;;  %v75_v50 = vpop.permute.xlu1 %74  ;;  %v70_v51 = vpop.permute.xlu0 %69  ;;  %v28_v45 = vld [vmem:[%s542_s0 + $0x68] sm:$0xff]  ;;  %vm200_vm10 = vcmp.eq.s32.totalorder %v182_v35, %v436_v23 }
  0x86   :  { %v132_v52 = vmul.f32 %v75_v50, %v20_v42  ;;  %v131_v53 = vmul.f32 %v70_v51, %v19_v43  ;;  %v183_v50 = vadd.s32 96, %v422_v18  ;;  %vm199_vm11 = vcmp.eq.s32.totalorder %v181_v37, %v436_v23 }
  0x87   :  { %v208_v54 = vsub.f32 1.0, %v153_v48  ;;  %v224_v55 = vsub.f32 0.0, %v153_v48  ;;  %v206_v56 = vsub.f32 1.0, %v151_v49  ;;  %v222_v57 = vsub.f32 0.0, %v151_v49 }
  0x88   :  { %v155_v58 = vmul.f32 %v433_v21, %v132_v52  ;;  %v154_v59 = vmul.f32 %v433_v21, %v131_v53  ;;  %v184_v49 = vadd.s32 104, %v422_v18  ;;  %vm201_vm13 = vcmp.eq.s32.totalorder %v183_v50, %v436_v23 }
  0x89   :  { %v240_v62 = vsel %vm192_vm2, %v208_v54, %v224_v55  ;;  %v238_v63 = vsel %vm190_vm3, %v206_v56, %v222_v57  ;;  %v85_v1 = vpop.permute.xlu1 %84  ;;  %v80_v3 = vpop.permute.xlu0 %79 }
  0x8a   :  { %256 = vst [vmem:[#allocation2 + $0x18] sm:$0xff] %v240_v62  ;;  %254 = vst [vmem:[#allocation2 + $0x8] sm:$0xff] %v238_v63  ;;  %v210_v4 = vsub.f32 1.0, %v155_v58  ;;  %v226_v5 = vsub.f32 0.0, %v155_v58  ;;  %v209_v6 = vsub.f32 1.0, %v154_v59  ;;  %v225_v7 = vsub.f32 0.0, %v154_v59 }
  0x8b   :  { %v134_v8 = vmul.f32 %v85_v1, %v22_v60  ;;  %v133_v9 = vmul.f32 %v80_v3, %v21_v61  ;;  %vm202_vm12 = vcmp.eq.s32.totalorder %v184_v49, %v436_v23  ;;  %v30_v63 = vld [vmem:[%s542_s0 + $0x78] sm:$0xff]  ;;  %v186_v3 = vadd.s32 120, %v422_v18  ;;  %s351_s0 = smov [#allocation2]  }
  0x8c   :  { %v242_v12 = vsel %vm194_vm4, %v210_v4, %v226_v5  ;;  %v241_v13 = vsel %vm193_vm5, %v209_v6, %v225_v7  ;;  %v185_v5 = vadd.s32 112, %v422_v18  ;;  %s310_s22 = sshll.u32 %s351_s0, 4  ;;  %s311_s22 = int_to_ptr.vmem [resolvable:$true] %s310_s22 }
  0x8d   :  { %258 = vst [vmem:[#allocation2 + $0x28] sm:$0xff] %v242_v12  ;;  %257 = vst [vmem:[#allocation2 + $0x20] sm:$0xff] %v241_v13  ;;  %v157_v16 = vmul.f32 %v433_v21, %v134_v8  ;;  %v156_v17 = vmul.f32 %v433_v21, %v133_v9  ;;  %v95_v19 = vpop.permute.xlu1 %94  ;;  %v90_v20 = vpop.permute.xlu0 %89  ;;  %vm204_vm14 = vcmp.eq.s32.totalorder %v186_v3, %v436_v23  ;;  %s328_s1 = scalar_lea.vmem %s311_s22, 2048  ;;  %p333_p1 = scmp.lt.s32.totalorder %s311_s22, %s311_s22 }
  0x8e   :  { %v136_v22 = vmul.f32 %v95_v19, %v24_v10  ;;  %v135_v24 = vmul.f32 %v90_v20, %v23_v11  ;;  %vm203_vm15 = vcmp.eq.s32.totalorder %v185_v5, %v436_v23  ;;  %p329_p0 = scmp.ne.s32.totalorder %s311_s22, %s328_s1  ;;  %p334_p2 = scmp.lt.s32.totalorder %s328_s1, %s328_s1 }
  0x8f   :  { %v212_v25 = vsub.f32 1.0, %v157_v16  ;;  %v228_v26 = vsub.f32 0.0, %v157_v16  ;;  %v211_v27 = vsub.f32 1.0, %v156_v17  ;;  %v227_v28 = vsub.f32 0.0, %v156_v17 }
  0x90   :  { %v159_v29 = vmul.f32 %v433_v21, %v136_v22  ;;  %v158_v30 = vmul.f32 %v433_v21, %v135_v24  ;;  %p335_p3 = por %p334_p2, %p333_p1 }
  0x91   :  { %v244_v33 = vsel %vm196_vm6, %v212_v25, %v228_v26  ;;  %v243_v34 = vsel %vm195_vm7, %v211_v27, %v227_v28  ;;  %v105_v36 = vpop.permute.xlu1 %104  ;;  %v100_v38 = vpop.permute.xlu0 %99 }
  0x92   :  { %260 = vst [vmem:[#allocation2 + $0x38] sm:$0xff] %v244_v33  ;;  %259 = vst [vmem:[#allocation2 + $0x30] sm:$0xff] %v243_v34  ;;  %v214_v39 = vsub.f32 1.0, %v159_v29  ;;  %v230_v40 = vsub.f32 0.0, %v159_v29  ;;  %v213_v41 = vsub.f32 1.0, %v158_v30  ;;  %v229_v42 = vsub.f32 0.0, %v158_v30  ;;  %p336_p4 = pnand %p335_p3, %p329_p0 }
  0x93   :  { %v138_v43 = vmul.f32 %v105_v36, %v26_v31  ;;  %v137_v44 = vmul.f32 %v100_v38, %v25_v32 }
  0x94   :  { %v246_v47 = vsel %vm198_vm8, %v214_v39, %v230_v40  ;;  %v245_v48 = vsel %vm197_vm9, %v213_v41, %v229_v42 }
  0x95   :  { %262 = vst [vmem:[#allocation2 + $0x48] sm:$0xff] %v246_v47  ;;  %261 = vst [vmem:[#allocation2 + $0x40] sm:$0xff] %v245_v48  ;;  %v161_v51 = vmul.f32 %v433_v21, %v138_v43  ;;  %v160_v52 = vmul.f32 %v433_v21, %v137_v44  ;;  %v115_v53 = vpop.permute.xlu1 %114  ;;  %v110_v54 = vpop.permute.xlu0 %109 }
  0x96   :  { %v140_v55 = vmul.f32 %v115_v53, %v28_v45  ;;  %v139_v56 = vmul.f32 %v110_v54, %v27_v46 }
  0x97   :  { %v216_v57 = vsub.f32 1.0, %v161_v51  ;;  %v232_v58 = vsub.f32 0.0, %v161_v51  ;;  %v215_v59 = vsub.f32 1.0, %v160_v52  ;;  %v231_v60 = vsub.f32 0.0, %v160_v52 }
  0x98   :  { %v163_v61 = vmul.f32 %v433_v21, %v140_v55  ;;  %v162_v62 = vmul.f32 %v433_v21, %v139_v56 }
  0x99   :  { %v248_v1 = vsel %vm200_vm10, %v216_v57, %v232_v58  ;;  %v247_v2 = vsel %vm199_vm11, %v215_v59, %v231_v60  ;;  %v125_v4 = vpop.permute.xlu1 %124  ;;  %v120_v6 = vpop.permute.xlu0 %119 }
  0x9a   :  { %264 = vst [vmem:[#allocation2 + $0x58] sm:$0xff] %v248_v1  ;;  %263 = vst [vmem:[#allocation2 + $0x50] sm:$0xff] %v247_v2  ;;  %v218_v7 = vsub.f32 1.0, %v163_v61  ;;  %v234_v8 = vsub.f32 0.0, %v163_v61  ;;  %v217_v9 = vsub.f32 1.0, %v162_v62  ;;  %v233_v10 = vsub.f32 0.0, %v162_v62 }
  0x9b   :  { %v142_v11 = vmul.f32 %v125_v4, %v30_v63  ;;  %v141_v12 = vmul.f32 %v120_v6, %v29_v0 }
  0x9c   :  { %v250_v13 = vsel %vm202_vm12, %v218_v7, %v234_v8  ;;  %v249_v14 = vsel %vm201_vm13, %v217_v9, %v233_v10 }
  0x9d   :  { %266 = vst [vmem:[#allocation2 + $0x68] sm:$0xff] %v250_v13  ;;  %265 = vst [vmem:[#allocation2 + $0x60] sm:$0xff] %v249_v14  ;;  %v165_v18 = vmul.f32 %v433_v21, %v142_v11  ;;  %v164_v15 = vmul.f32 %v433_v21, %v141_v12 }
  0x9f   :  { %v220_v16 = vsub.f32 1.0, %v165_v18  ;;  %v236_v17 = vsub.f32 0.0, %v165_v18  ;;  %v219_v19 = vsub.f32 1.0, %v164_v15  ;;  %v235_v20 = vsub.f32 0.0, %v164_v15 }
  0xa1   :  { %v252_v22 = vsel %vm204_vm14, %v220_v16, %v236_v17  ;;  %v251_v24 = vsel %vm203_vm15, %v219_v19, %v235_v20 }
  0xa2   :  { %268 = vst [vmem:[#allocation2 + $0x78] sm:$0xff] %v252_v22  ;;  %267 = vst [vmem:[#allocation2 + $0x70] sm:$0xff] %v251_v24 }
  0xa3   :  { %339 = shalt.err (!%p336_p4)
}
  0xa4   :  { %s352_s23 = smov 128   ;;  %s353_s24 = smov 8  }
  0xa5   :  { %316 = dma.vmem_to_hbm [thread:$0]  %s311_s22, 2048, %s545_s3, [#allocation3], %s352_s23, %s352_s23, %s353_s24  }
  0xa6   :  { %348 = dma.done.wait [#allocation3], 2048  }
  0xa7   :  { %349 = vsyncadd [#allocation3], 4294965248 }
  0xa8   :  { %320 = vsyncpa [#allocation3], 1 }

</bundles_post_ra>
